<compile_context>
chip_gen: v7x
topology: tpu7x:2x2x1
jax: 0.10.0
libtpu: 0.0.40
codegen_flags: <defaults>
</compile_context>

<pallas_src>
import functools
import math

import jax
import jax.numpy as jnp
from jax.experimental import pallas as pl
from jax.experimental.pallas import tpu as pltpu


def _cdiv(a, b):
    return -(-a // b)


# --------------------------------------------------------------------------
# Pallas kernels
# --------------------------------------------------------------------------
def _ce_rows_kernel(logits_ref, labels_ref, loss_ref, *,
                    n_classes, ignore_lb, rows_total, tile_r, need_mask):
    # logits_ref: (C, TR, 128) f32/bf16 | labels_ref: (TR, 128) i32
    # loss_ref:   (TR, 128) f32
    lbl = labels_ref[...]

    # Class-axis max across planes (pure VPU); exact in the input dtype.
    m = logits_ref[0]
    for c in range(1, n_classes):
        m = jnp.maximum(m, logits_ref[c])
    m32 = m.astype(jnp.float32)

    # Log-sum-exp + target-logit gather one class plane at a time: keeps live
    # temporaries at a few (TR,128) f32 tiles (no (C,TR,128) f32 intermediate,
    # no materialized full-tile upcast).
    s = jnp.zeros(m32.shape, jnp.float32)
    tgt = jnp.zeros(m32.shape, jnp.float32)
    for c in range(n_classes):
        xc = logits_ref[c].astype(jnp.float32)   # fuses into subtract/select
        s = s + jnp.exp(xc - m32)
        tgt = tgt + jnp.where(lbl == c, xc, 0.0)

    loss = jnp.where(lbl != ignore_lb, (m32 - tgt) + jnp.log(s), 0.0)
    if need_mask:  # partial last row-block: zero pixels past the true extent
        row = (jax.lax.broadcasted_iota(jnp.int32, lbl.shape, 0)
               + pl.program_id(1) * tile_r)
        loss = jnp.where(row < rows_total, loss, 0.0)
    loss_ref[...] = loss


def _ce_flat_kernel(logits_ref, labels_ref, loss_ref, *,
                    ignore_lb, hw_total, tile_p, need_mask):
    # Fallback layout when HW isn't 128-divisible (class axis on sublanes).
    # logits_ref: (C, TP) | labels_ref: (1, TP) i32 | loss_ref: (1, TP) f32
    x = logits_ref[...]
    lbl = labels_ref[...]
    m32 = jnp.max(x, axis=0, keepdims=True).astype(jnp.float32)
    s = jnp.sum(jnp.exp(x.astype(jnp.float32) - m32), axis=0, keepdims=True)
    cls = jax.lax.broadcasted_iota(jnp.int32, x.shape, 0)
    tgt = jnp.sum(jnp.where(cls == lbl, x, 0), axis=0,
                  keepdims=True).astype(jnp.float32)
    loss = jnp.where(lbl != ignore_lb, (m32 - tgt) + jnp.log(s), 0.0)
    if need_mask:  # partial last pixel block (no HBM padding copy needed)
        pix = (jax.lax.broadcasted_iota(jnp.int32, lbl.shape, 1)
               + pl.program_id(1) * tile_p)
        loss = jnp.where(pix < hw_total, loss, 0.0)
    loss_ref[...] = loss


# --------------------------------------------------------------------------
# Tiling / VMEM planning
# --------------------------------------------------------------------------
def _vmem_limit_bytes():
    """Kernel VMEM limit derived from the actual chip (64 MiB on v7x,
    128 MiB on v5e/v6e), with headroom below the physical capacity."""
    try:
        cap = int(pltpu.get_tpu_info().vmem_capacity_bytes)
    except Exception:
        cap = 64 << 20
    limit = min(cap, 64 << 20)
    if limit >= cap:
        limit = cap - (4 << 20)
    return max(limit, 16 << 20)


def _row_tile(rows, total_rows):
    """Legal row tile for a (rows, 128) block: full extent or a multiple of 8."""
    if rows >= total_rows:
        return total_rows
    return min(total_rows, max(8, (rows // 8) * 8))


def _even_steps(tile, total, n_imgs, shrink):
    """Shrink the tile until the grid has >=2 and (if small) an even number of
    steps so both v7x TensorCores get work (no effect on 1-TC v5e/v6e)."""
    def steps(t):
        return n_imgs * _cdiv(total, t)
    while steps(tile) < 2 or (steps(tile) % 2 and steps(tile) < 8):
        smaller = shrink(tile)
        if smaller == tile:
            break
        tile = smaller
    return tile


# --------------------------------------------------------------------------
# Per-pixel cross-entropy (the Pallas hot path)
# --------------------------------------------------------------------------
def per_pixel_ce(logits_nchw, labels_nhw, *, ignore_lb=255):
    """logits (N,C,H,W) f32/bf16, labels (N,H,W) int -> (N*H*W,) f32 per-pixel
    CE (0 for ignored pixels), matching nn.CrossEntropyLoss(reduction='none')."""
    N, C, H, W = logits_nchw.shape
    HW = H * W
    itemsize = jnp.dtype(logits_nchw.dtype).itemsize
    labels = labels_nhw.reshape(N, HW).astype(jnp.int32)

    vmem_limit = _vmem_limit_bytes()
    budget = int(vmem_limit * 0.7)

    if HW % 128 == 0:
        # Lane-dense 2-D pixel layout: (N, C, R, 128) / (N, R, 128), zero-copy.
        R = HW // 128
        # Honest per-pixel VMEM bytes: double-buffered logits blocks, labels +
        # loss blocks, and a few (rows,128) f32 kernel temporaries.
        bpp = 2 * C * itemsize + 2 * C * 4 + 64
        tile_r = _row_tile(max(budget // bpp, 1024) // 128, R)
        tile_r = _even_steps(tile_r, R, N, lambda t: _row_tile(t // 2, R))

        kernel = functools.partial(
            _ce_rows_kernel, n_classes=C, ignore_lb=ignore_lb,
            rows_total=R, tile_r=tile_r, need_mask=(R % tile_r != 0))
        loss = pl.pallas_call(
            kernel,
            out_shape=jax.ShapeDtypeStruct((N, R, 128), jnp.float32),
            grid=(N, _cdiv(R, tile_r)),
            in_specs=[
                pl.BlockSpec((None, C, tile_r, 128), lambda n, i: (n, 0, i, 0)),
                pl.BlockSpec((None, tile_r, 128), lambda n, i: (n, i, 0)),
            ],
            out_specs=pl.BlockSpec((None, tile_r, 128), lambda n, i: (n, i, 0)),
            compiler_params=pltpu.CompilerParams(
                dimension_semantics=("parallel", "parallel"),
                vmem_limit_bytes=vmem_limit),
        )(logits_nchw.reshape(N, C, R, 128), labels.reshape(N, R, 128))
        return loss.reshape(-1)

    # Fallback: flat pixel axis when HW isn't 128-divisible.  No padding copy
    # of the logits; the partial tail block is masked inside the kernel.
    bpp = 2 * C * itemsize + 2 * C * 4 + 2 * 2 * 8 * 4 + 64
    tile_p = max((budget // bpp) // 128 * 128, 128)
    tile_p = min(tile_p, max(128, (HW // 128) * 128))
    tile_p = _even_steps(tile_p, HW, N,
                         lambda t: max(128, (t // 2) // 128 * 128))

    kernel = functools.partial(
        _ce_flat_kernel, ignore_lb=ignore_lb, hw_total=HW,
        tile_p=tile_p, need_mask=(HW % tile_p != 0))
    loss = pl.pallas_call(
        kernel,
        out_shape=jax.ShapeDtypeStruct((N, 1, HW), jnp.float32),
        grid=(N, _cdiv(HW, tile_p)),
        in_specs=[
            pl.BlockSpec((None, C, tile_p), lambda n, i: (n, 0, i)),
            pl.BlockSpec((None, 1, tile_p), lambda n, i: (n, 0, i)),
        ],
        out_specs=pl.BlockSpec((None, 1, tile_p), lambda n, i: (n, 0, i)),
        compiler_params=pltpu.CompilerParams(
            dimension_semantics=("parallel", "parallel"),
            vmem_limit_bytes=vmem_limit),
    )(logits_nchw.reshape(N, C, HW), labels.reshape(N, 1, HW))
    return loss.reshape(-1)


# --------------------------------------------------------------------------
# OHEM selection (no sort / no huge-k top_k)
# --------------------------------------------------------------------------
_MAX_FINITE_F32_BITS = 0x7F7FFFFF


def _kth_largest(x, k):
    """Exact k-th largest value of a non-negative f32 vector (k >= 1) via a
    31-step bisection on int32 bit patterns (order-preserving for x >= 0)."""
    bits = jax.lax.bitcast_convert_type(x, jnp.int32)

    def body(_, state):
        lo, hi = state                      # invariant: count(bits >= lo) >= k
        mid = lo + (hi - lo + 1) // 2
        ok = jnp.sum(bits >= mid, dtype=jnp.int32) >= k
        return jnp.where(ok, mid, lo), jnp.where(ok, hi, mid - 1)

    lo, _ = jax.lax.fori_loop(0, 31, body,
                              (jnp.int32(0), jnp.int32(_MAX_FINITE_F32_BITS)))
    return jax.lax.bitcast_convert_type(lo, jnp.float32)


def ohem_ce_loss(logits_nchw, labels_nhw, *, thresh, n_min, ignore_lb=255):
    """Matches OhemCELoss.forward for logits (N,C,H,W) and labels (N,H,W)."""
    N, C, H, W = logits_nchw.shape
    total = N * H * W
    if not 0 < n_min < total:  # torch indexes loss[n_min] -> needs n_min < N*H*W
        raise ValueError(f"n_min must be in (0, {total}), got {n_min}")

    loss = per_pixel_ce(logits_nchw, labels_nhw, ignore_lb=ignore_lb)  # (P,) f32
    thresh_val = jnp.float32(-math.log(float(thresh)))

    # TODO(synk): fold per-tile ">thresh" count/sum (and a bit-pattern histogram
    # for the k-th largest) into the CE kernel as tiny extra outputs to remove
    # the remaining O(30) epilogue passes over `loss`.
    gt = loss > thresh_val
    cnt_gt = jnp.sum(gt, dtype=jnp.int32)
    sum_gt = jnp.sum(jnp.where(gt, loss, 0.0))
    # sorted_desc[n_min] > thresh  <=>  at least n_min+1 losses exceed thresh
    cond = cnt_gt >= n_min + 1
    mean_above = sum_gt / jnp.maximum(cnt_gt.astype(jnp.float32), 1.0)

    # mean of the n_min largest losses (ties handled exactly), without sorting
    kth = _kth_largest(loss, n_min)
    cnt_k = jnp.sum(loss > kth, dtype=jnp.int32)
    sum_k = jnp.sum(jnp.where(loss > kth, loss, 0.0))
    mean_topk = (sum_k + (n_min - cnt_k).astype(jnp.float32) * kth) / n_min

    return jnp.where(cond, mean_above, mean_topk)


# --------------------------------------------------------------------------
if __name__ == "__main__":
    key = jax.random.PRNGKey(0)
    N, C, H, W = 2, 4, 16, 16
    k1, k2, k3 = jax.random.split(key, 3)

    logits = jax.random.normal(k1, (N, C, H, W), dtype=jnp.float32)
    labels = jax.random.randint(k2, (N, H, W), 0, C, dtype=jnp.int32)
    ignore_mask = jax.random.uniform(k3, (N, H, W)) < 0.1
    labels = jnp.where(ignore_mask, 255, labels)

    thresh = 0.7
    n_min = (N * H * W) // 16

    fn = jax.jit(functools.partial(ohem_ce_loss, thresh=thresh, n_min=n_min,
                                   ignore_lb=255))
    out = jax.block_until_ready(fn(logits, labels))

    # ---- correctness checks against a pure-JAX reference ----
    loss_k = jax.block_until_ready(per_pixel_ce(logits, labels, ignore_lb=255))
    logp = jax.nn.log_softmax(logits.astype(jnp.float32), axis=1)
    gathered = jnp.take_along_axis(logp, jnp.clip(labels, 0, C - 1)[:, None],
                                   axis=1)[:, 0]
    loss_ref = jnp.where(labels == 255, 0.0, -gathered).reshape(-1)
    assert jnp.allclose(loss_k, loss_ref, atol=1e-5, rtol=1e-5)

    # reference OHEM selection (sort-based) applied to the same per-pixel loss
    tval = -math.log(thresh)
    srt = jnp.sort(loss_k)[::-1]
    ref_out = jnp.where(
        srt[n_min] > tval,
        jnp.sum(jnp.where(loss_k > tval, loss_k, 0.0))
        / jnp.maximum(jnp.sum(loss_k > tval), 1),
        jnp.mean(srt[:n_min]))

    assert out.shape == () and bool(jnp.isfinite(out))
    assert jnp.allclose(out, ref_out, atol=1e-5, rtol=1e-5)
    print("KERNEL_OK")
</pallas_src>

<mosaic_0001>
module attributes {stable_mosaic.version = 11 : i64} {
  func.func @_ce_rows_kernel(%arg0: i32, %arg1: i32, %arg2: memref<1x4x2x128xf32, #tpu.memory_space<vmem>>, %arg3: memref<1x2x128xi32, #tpu.memory_space<vmem>>, %arg4: memref<1x2x128xf32, #tpu.memory_space<vmem>>) attributes {dimension_semantics = [#tpu.dimension_semantics<parallel>, #tpu.dimension_semantics<parallel>], iteration_bounds = array<i64: 2, 1>, scalar_prefetch = 0 : i64, scratch_operands = 0 : i64, tpu.core_type = #tpu.core_type<tc>, window_params = [{transform_indices = @transform_0, window_bounds = array<i64: 1, 4, 2, 128>}, {transform_indices = @transform_1, window_bounds = array<i64: 1, 2, 128>}, {transform_indices = @transform_2, window_bounds = array<i64: 1, 2, 128>}]} {
    %c0 = arith.constant 0 : index
    %c0_0 = arith.constant 0 : index
    %c0_1 = arith.constant 0 : index
    %0 = vector.load %arg3[%c0, %c0_0, %c0_1] : memref<1x2x128xi32, #tpu.memory_space<vmem>>, vector<1x2x128xi32>
    %1 = vector.shape_cast %0 : vector<1x2x128xi32> to vector<2x128xi32>
    %c0_2 = arith.constant 0 : index
    %c0_3 = arith.constant 0 : index
    %c0_4 = arith.constant 0 : index
    %c0_5 = arith.constant 0 : index
    %2 = vector.load %arg2[%c0_2, %c0_3, %c0_4, %c0_5] : memref<1x4x2x128xf32, #tpu.memory_space<vmem>>, vector<1x1x2x128xf32>
    %3 = vector.shape_cast %2 : vector<1x1x2x128xf32> to vector<2x128xf32>
    %c0_6 = arith.constant 0 : index
    %c1 = arith.constant 1 : index
    %c0_7 = arith.constant 0 : index
    %c0_8 = arith.constant 0 : index
    %4 = vector.load %arg2[%c0_6, %c1, %c0_7, %c0_8] : memref<1x4x2x128xf32, #tpu.memory_space<vmem>>, vector<1x1x2x128xf32>
    %5 = vector.shape_cast %4 : vector<1x1x2x128xf32> to vector<2x128xf32>
    %6 = arith.maximumf %3, %5 : vector<2x128xf32>
    %c0_9 = arith.constant 0 : index
    %c2 = arith.constant 2 : index
    %c0_10 = arith.constant 0 : index
    %c0_11 = arith.constant 0 : index
    %7 = vector.load %arg2[%c0_9, %c2, %c0_10, %c0_11] : memref<1x4x2x128xf32, #tpu.memory_space<vmem>>, vector<1x1x2x128xf32>
    %8 = vector.shape_cast %7 : vector<1x1x2x128xf32> to vector<2x128xf32>
    %9 = arith.maximumf %6, %8 : vector<2x128xf32>
    %c0_12 = arith.constant 0 : index
    %c3 = arith.constant 3 : index
    %c0_13 = arith.constant 0 : index
    %c0_14 = arith.constant 0 : index
    %10 = vector.load %arg2[%c0_12, %c3, %c0_13, %c0_14] : memref<1x4x2x128xf32, #tpu.memory_space<vmem>>, vector<1x1x2x128xf32>
    %11 = vector.shape_cast %10 : vector<1x1x2x128xf32> to vector<2x128xf32>
    %12 = arith.maximumf %9, %11 : vector<2x128xf32>
    %cst = arith.constant 0.000000e+00 : f32
    %13 = vector.broadcast %cst : f32 to vector<2x128xf32>
    %cst_15 = arith.constant 0.000000e+00 : f32
    %14 = vector.broadcast %cst_15 : f32 to vector<2x128xf32>
    %c0_16 = arith.constant 0 : index
    %c0_17 = arith.constant 0 : index
    %c0_18 = arith.constant 0 : index
    %c0_19 = arith.constant 0 : index
    %15 = vector.load %arg2[%c0_16, %c0_17, %c0_18, %c0_19] : memref<1x4x2x128xf32, #tpu.memory_space<vmem>>, vector<1x1x2x128xf32>
    %16 = vector.shape_cast %15 : vector<1x1x2x128xf32> to vector<2x128xf32>
    %17 = arith.subf %16, %12 : vector<2x128xf32>
    %18 = math.exp %17 : vector<2x128xf32>
    %19 = arith.addf %13, %18 : vector<2x128xf32>
    %c0_i32 = arith.constant 0 : i32
    %20 = vector.broadcast %c0_i32 : i32 to vector<2x128xi32>
    %21 = arith.cmpi eq, %1, %20 : vector<2x128xi32>
    %cst_20 = arith.constant 0.000000e+00 : f32
    %22 = vector.broadcast %cst_20 : f32 to vector<2x128xf32>
    %23 = arith.select %21, %16, %22 : vector<2x128xi1>, vector<2x128xf32>
    %24 = arith.addf %14, %23 : vector<2x128xf32>
    %c0_21 = arith.constant 0 : index
    %c1_22 = arith.constant 1 : index
    %c0_23 = arith.constant 0 : index
    %c0_24 = arith.constant 0 : index
    %25 = vector.load %arg2[%c0_21, %c1_22, %c0_23, %c0_24] : memref<1x4x2x128xf32, #tpu.memory_space<vmem>>, vector<1x1x2x128xf32>
    %26 = vector.shape_cast %25 : vector<1x1x2x128xf32> to vector<2x128xf32>
    %27 = arith.subf %26, %12 : vector<2x128xf32>
    %28 = math.exp %27 : vector<2x128xf32>
    %29 = arith.addf %19, %28 : vector<2x128xf32>
    %c1_i32 = arith.constant 1 : i32
    %30 = vector.broadcast %c1_i32 : i32 to vector<2x128xi32>
    %31 = arith.cmpi eq, %1, %30 : vector<2x128xi32>
    %cst_25 = arith.constant 0.000000e+00 : f32
    %32 = vector.broadcast %cst_25 : f32 to vector<2x128xf32>
    %33 = arith.select %31, %26, %32 : vector<2x128xi1>, vector<2x128xf32>
    %34 = arith.addf %24, %33 : vector<2x128xf32>
    %c0_26 = arith.constant 0 : index
    %c2_27 = arith.constant 2 : index
    %c0_28 = arith.constant 0 : index
    %c0_29 = arith.constant 0 : index
    %35 = vector.load %arg2[%c0_26, %c2_27, %c0_28, %c0_29] : memref<1x4x2x128xf32, #tpu.memory_space<vmem>>, vector<1x1x2x128xf32>
    %36 = vector.shape_cast %35 : vector<1x1x2x128xf32> to vector<2x128xf32>
    %37 = arith.subf %36, %12 : vector<2x128xf32>
    %38 = math.exp %37 : vector<2x128xf32>
    %39 = arith.addf %29, %38 : vector<2x128xf32>
    %c2_i32 = arith.constant 2 : i32
    %40 = vector.broadcast %c2_i32 : i32 to vector<2x128xi32>
    %41 = arith.cmpi eq, %1, %40 : vector<2x128xi32>
    %cst_30 = arith.constant 0.000000e+00 : f32
    %42 = vector.broadcast %cst_30 : f32 to vector<2x128xf32>
    %43 = arith.select %41, %36, %42 : vector<2x128xi1>, vector<2x128xf32>
    %44 = arith.addf %34, %43 : vector<2x128xf32>
    %c0_31 = arith.constant 0 : index
    %c3_32 = arith.constant 3 : index
    %c0_33 = arith.constant 0 : index
    %c0_34 = arith.constant 0 : index
    %45 = vector.load %arg2[%c0_31, %c3_32, %c0_33, %c0_34] : memref<1x4x2x128xf32, #tpu.memory_space<vmem>>, vector<1x1x2x128xf32>
    %46 = vector.shape_cast %45 : vector<1x1x2x128xf32> to vector<2x128xf32>
    %47 = arith.subf %46, %12 : vector<2x128xf32>
    %48 = math.exp %47 : vector<2x128xf32>
    %49 = arith.addf %39, %48 : vector<2x128xf32>
    %c3_i32 = arith.constant 3 : i32
    %50 = vector.broadcast %c3_i32 : i32 to vector<2x128xi32>
    %51 = arith.cmpi eq, %1, %50 : vector<2x128xi32>
    %cst_35 = arith.constant 0.000000e+00 : f32
    %52 = vector.broadcast %cst_35 : f32 to vector<2x128xf32>
    %53 = arith.select %51, %46, %52 : vector<2x128xi1>, vector<2x128xf32>
    %54 = arith.addf %44, %53 : vector<2x128xf32>
    %c255_i32 = arith.constant 255 : i32
    %55 = vector.broadcast %c255_i32 : i32 to vector<2x128xi32>
    %56 = arith.cmpi ne, %1, %55 : vector<2x128xi32>
    %57 = arith.subf %12, %54 : vector<2x128xf32>
    %58 = math.log %49 : vector<2x128xf32>
    %59 = arith.addf %57, %58 : vector<2x128xf32>
    %cst_36 = arith.constant 0.000000e+00 : f32
    %60 = vector.broadcast %cst_36 : f32 to vector<2x128xf32>
    %61 = arith.select %56, %59, %60 : vector<2x128xi1>, vector<2x128xf32>
    %c0_37 = arith.constant 0 : index
    %c0_38 = arith.constant 0 : index
    %c0_39 = arith.constant 0 : index
    %62 = vector.load %arg4[%c0_37, %c0_38, %c0_39] : memref<1x2x128xf32, #tpu.memory_space<vmem>>, vector<1x2x128xf32>
    %63 = vector.shape_cast %62 : vector<1x2x128xf32> to vector<2x128xf32>
    %64 = vector.shape_cast %61 : vector<2x128xf32> to vector<1x2x128xf32>
    tpu.vector_store %arg4[%c0_37, %c0_38, %c0_39], %64 {strides = array<i32>} : memref<1x2x128xf32, #tpu.memory_space<vmem>>, vector<1x2x128xf32>,
    return
  }
  func.func @transform_0(%arg0: i32, %arg1: i32) -> (i32, i32, i32, i32) {
    %c0_i32 = arith.constant 0 : i32
    %c0_i32_0 = arith.constant 0 : i32
    %c0_i32_1 = arith.constant 0 : i32
    return %arg0, %c0_i32, %arg1, %c0_i32_0 : i32, i32, i32, i32
  }
  func.func @transform_1(%arg0: i32, %arg1: i32) -> (i32, i32, i32) {
    %c0_i32 = arith.constant 0 : i32
    %c0_i32_0 = arith.constant 0 : i32
    return %arg0, %arg1, %c0_i32 : i32, i32, i32
  }
  func.func @transform_2(%arg0: i32, %arg1: i32) -> (i32, i32, i32) {
    %c0_i32 = arith.constant 0 : i32
    %c0_i32_0 = arith.constant 0 : i32
    return %arg0, %arg1, %c0_i32 : i32, i32, i32
  }
}

</mosaic_0001>

<bundles_post_ra>
// kernel: ohem_ce_loss.1
= control target key start
LH: loop header
LB: loop body
LE: loop exit
PB: predicated region body
PF: predicated region fallthrough
CT: control target
= control target key end

     0   :  { %s427_s9 = smov 0   ;;  %s429_s10 = smov 0   ;;  %s471_s0 = inlined_call_operand.vmem [shape: f32[2,4,2,128], index: 0, kind: input, shape index: {}]   ;;  %s472_s1 = inlined_call_operand.vmem [shape: s32[2,2,128], index: 1, kind: input, shape index: {}]   ;;  %s473_s2 = inlined_call_operand.vmem [shape: f32[2,2,128], index: 2, kind: output, shape index: {}]  }
   0x1   :  { %s431_s11 = smov 0  }
   0x2 LB: > { %s24_s12 = sadd.s32 1, %s406_s10  ;;  %p343_p0 = scmp.ge.s32.totalorder %s410_s11, 1  ;;  %s410_s11 = sphi %s431_s11, %s12_s11   ;;  %s406_s10 = sphi %s429_s10, %s475_s10   ;;  %s402_s9 = sphi %s427_s9, %s474_s9  }
   0x3   : > { %p26_p1 = scmp.ge.s32.totalorder %s24_s12, 2  ;;  %p145_p2 = scmp.lt.s32.totalorder %s410_s11, 3 }
   0x5   : > { %s477_s12 = smov (%p26_p1, %s24_s12), 0  ;;  %p146_p3 = pnand %p343_p0, %p145_p2 }
   0x6   : > { %p179_p4 = scmp.lt.s32.totalorder (!%p146_p3), %s402_s9, 1 }
   0x7   : > { %149 = sbr.rel (%p146_p3) target bundleno = 63 (0x3f), region = 28 }
   0xe   : > { %s479_s9 = smov (!%p179_p4, %s402_s9), 1 }
   0xf   : > { %s353_s13 = sshll.u32 %s479_s9, 3  ;;  %s346_s17 = sshll.u32 %s479_s9, 1 }
  0x10   : > { %s186_s16 = scalar_lea.vmem %s471_s0, %s353_s13  ;;  %s193_s20 = scalar_lea.vmem %s472_s1, %s346_s17 }
  0x11   : > { %v202_v0 = vld [vmem:[%s186_s16] sm:$0x3]  ;;  %v348_v1 = vld [vmem:[%s186_s16 + $0x2] sm:$0x3]  ;;  %v349_v3 = vld [vmem:[%s186_s16 + $0x4] sm:$0x3]  ;;  %s200_s23 = scalar_lea.vmem %s473_s2, %s346_s17 }
  0x12   : > { %v205_v2 = vmax.f32 %v202_v0, %v348_v1  ;;  %v350_v4 = vld [vmem:[%s186_s16 + $0x6] sm:$0x3]  ;;  %v201_v15 = vld [vmem:[%s193_s20] sm:$0x3] }
  0x13   : > { %vm216_vm0 = vcmp.eq.s32.totalorder %v201_v15, 0  ;;  %vm223_vm1 = vcmp.eq.s32.totalorder %v201_v15, 1  ;;  %vm230_vm2 = vcmp.eq.s32.totalorder %v201_v15, 2  ;;  %vm237_vm3 = vcmp.eq.s32.totalorder %v201_v15, 3 }
  0x14   : > { %v208_v5 = vmax.f32 %v205_v2, %v349_v3  ;;  %v217_v19 = vsel %vm216_vm0, %v202_v0, 0.0  ;;  %v224_v21 = vsel %vm223_vm1, %v348_v1, 0.0  ;;  %v231_v25 = vsel %vm230_vm2, %v349_v3, 0.0 }
  0x15   : > { %v225_v24 = vadd.f32 %v224_v21, %v217_v19  ;;  %v238_v28 = vsel %vm237_vm3, %v350_v4, 0.0  ;;  %vm240_vm4 = vcmp.ne.s32.totalorder %v201_v15, 255 }
  0x16   : > { %v211_v6 = vmax.f32 %v208_v5, %v350_v4 }
  0x17   : > { %v232_v27 = vadd.f32 %v231_v25, %v225_v24 }
  0x18   : > { %v212_v7 = vsub.f32 %v202_v0, %v211_v6  ;;  %v219_v8 = vsub.f32 %v348_v1, %v211_v6  ;;  %v226_v9 = vsub.f32 %v349_v3, %v211_v6  ;;  %v233_v10 = vsub.f32 %v350_v4, %v211_v6 }
  0x19   : > { %v239_v29 = vadd.f32 %v238_v28, %v232_v27 }
  0x1a   : > { %v213_v11 = vmul.f32 1.442695, %v212_v7  ;;  %v220_v12 = vmul.f32 1.442695, %v219_v8  ;;  %v227_v13 = vmul.f32 1.442695, %v226_v9 }
  0x1b   : > { %v234_v14 = vmul.f32 1.442695, %v233_v10  ;;  %v241_v30 = vsub.f32 %v211_v6, %v239_v29 }
  0x1c   : > { %378 = vpow2.f32 %v213_v11 }
  0x1d   : > { %380 = vpow2.f32 %v220_v12 }
  0x1e   : > { %382 = vpow2.f32 %v227_v13 }
  0x1f   : > { %384 = vpow2.f32 %v234_v14 }
  0x26   : > { %v379_v16 = vpop.eup %378 }
  0x27   : > { %v381_v17 = vpop.eup %380 }
  0x28   : > { %v383_v18 = vpop.eup %382  ;;  %v222_v20 = vadd.f32 %v381_v17, %v379_v16 }
  0x29   : > { %v385_v22 = vpop.eup %384 }
  0x2a   : > { %v229_v23 = vadd.f32 %v383_v18, %v222_v20 }
  0x2c   : > { %v236_v26 = vadd.f32 %v385_v22, %v229_v23 }
  0x2e   : > { %386 = vlog2.f32 %v236_v26 }
  0x38   : > { %v387_v31 = vpop.eup %386 }
  0x39   : > { %v243_v32 = vmul.f32 0.6931472, %v387_v31 }
  0x3b   : > { %v244_v33 = vadd.f32 %v243_v32, %v241_v30 }
  0x3d   : > { %v245_v34 = vsel %vm240_vm4, %v244_v33, 0.0 }
  0x3e   : > { %246 = vst [vmem:[%s200_s23] sm:$0x3] %v245_v34 }
  0x3f PF: > { %s12_s11 = sadd.s32 1, %s410_s11   ;;  %s474_s9 = smov %s406_s10 }
  0x40   : > { %p9_p5 = scmp.ge.s32.totalorder %s12_s11, 4   ;;  %s475_s10 = smov %s477_s12 }
  0x42   :  { %11 = sbr.rel (!%p9_p5) target bundleno = 2 (0x2), region = 64 }

</bundles_post_ra>
